<compile_context>
chip_gen: v7x
topology: tpu7x:2x2x1
jax: 0.10.0
libtpu: 0.0.40
codegen_flags: <defaults>
</compile_context>

<pallas_src>
import functools
import math

import jax
import jax.numpy as jnp
from jax.experimental import pallas as pl
from jax.experimental.pallas import tpu as pltpu

_VMEM_LIMIT = 48 * 1024 * 1024  # stay under v7x's 64 MiB physical VMEM


def _pick_tile(n: int, target: int) -> int:
    """Largest multiple-of-8 divisor of n that is <= target, else n itself."""
    if n <= target:
        return n
    t = (target // 8) * 8
    while t >= 8:
        if n % t == 0:
            return t
        t -= 8
    return n


# ---------------------------------------------------------------------------
# Row-tiled linear:  out = x @ W^T + b   (W passed pre-transposed, bf16)
# ---------------------------------------------------------------------------
def _linear_kernel(x_ref, w_ref, b_ref, o_ref):
    # x_ref: (tr, K)   w_ref: (K, N) bf16   b_ref: (1, N) f32   o_ref: (tr, N)
    x = x_ref[...].astype(jnp.bfloat16)            # bf16 MXU operands
    acc = jnp.dot(x, w_ref[...], preferred_element_type=jnp.float32)
    o_ref[...] = (acc + b_ref[...]).astype(o_ref.dtype)


def _linear(x2d, w_t_bf16, b_2d, out_dtype):
    R, K = x2d.shape
    N = w_t_bf16.shape[1]
    tr = _pick_tile(R, 256)
    return pl.pallas_call(
        _linear_kernel,
        out_shape=jax.ShapeDtypeStruct((R, N), out_dtype),
        grid_spec=pltpu.PrefetchScalarGridSpec(
            num_scalar_prefetch=0,
            grid=(R // tr,),
            in_specs=[
                pl.BlockSpec((tr, K), lambda r: (r, 0)),   # activations
                pl.BlockSpec((K, N), lambda r: (0, 0)),    # W^T (bf16, resident)
                pl.BlockSpec((1, N), lambda r: (0, 0)),    # bias
            ],
            out_specs=pl.BlockSpec((tr, N), lambda r: (r, 0)),
        ),
        compiler_params=pltpu.CompilerParams(
            dimension_semantics=("parallel",),
            vmem_limit_bytes=_VMEM_LIMIT),
    )(x2d, w_t_bf16, b_2d)


# ---------------------------------------------------------------------------
# Flash attention (non-causal), heads batched in a single contraction.
# ---------------------------------------------------------------------------
def _flash_attn_kernel(q_ref, k_ref, v_ref, o_ref,
                       q_sc, m_sc, l_sc, acc_sc, *, scale):
    # q_ref: (1, H, tq, hd)  k_ref/v_ref: (1, H, tk, hd)  o_ref: (1, H, tq, hd)
    ki = pl.program_id(2)

    @pl.when(ki == 0)
    def _init():
        # Scale Q once per q-tile (not the (tq,tk) scores) and cast to bf16.
        q_sc[...] = (q_ref[0] * scale).astype(q_sc.dtype)
        m_sc[...] = jnp.full_like(m_sc, -jnp.inf)
        l_sc[...] = jnp.zeros_like(l_sc)
        acc_sc[...] = jnp.zeros_like(acc_sc)

    k = k_ref[0].astype(jnp.bfloat16)              # (H, tk, hd)
    v = v_ref[0].astype(jnp.bfloat16)              # (H, tk, hd)

    # Batched over heads, contraction on hd (no materialized transpose).
    s = jnp.einsum('hqd,hkd->hqk', q_sc[...], k,
                   preferred_element_type=jnp.float32)      # (H, tq, tk) f32

    m_prev = m_sc[...]
    m_new = jnp.maximum(m_prev, s.max(axis=-1, keepdims=True))
    alpha = jnp.exp(m_prev - m_new)                # f32 softmax math
    p = jnp.exp(s - m_new)

    l_sc[...] = alpha * l_sc[...] + p.sum(axis=-1, keepdims=True)
    acc_sc[...] = alpha * acc_sc[...] + jnp.einsum(
        'hqk,hkd->hqd', p.astype(jnp.bfloat16), v,
        preferred_element_type=jnp.float32)
    m_sc[...] = m_new

    @pl.when(ki == pl.num_programs(2) - 1)
    def _finalize():
        inv_l = pl.reciprocal(l_sc[...], approx=True)       # EUP, ~free
        o_ref[0] = (acc_sc[...] * inv_l).astype(o_ref.dtype)


def _flash_attention(q, k, v, *, scale, tq, tk):
    B, H, T, hd = q.shape
    kernel = functools.partial(_flash_attn_kernel, scale=scale)
    return pl.pallas_call(
        kernel,
        out_shape=jax.ShapeDtypeStruct((B, H, T, hd), jnp.bfloat16),
        grid_spec=pltpu.PrefetchScalarGridSpec(
            num_scalar_prefetch=0,
            grid=(B, T // tq, T // tk),
            in_specs=[
                pl.BlockSpec((1, H, tq, hd), lambda b, qi, ki: (b, 0, qi, 0)),
                pl.BlockSpec((1, H, tk, hd), lambda b, qi, ki: (b, 0, ki, 0)),
                pl.BlockSpec((1, H, tk, hd), lambda b, qi, ki: (b, 0, ki, 0)),
            ],
            out_specs=pl.BlockSpec((1, H, tq, hd),
                                   lambda b, qi, ki: (b, 0, qi, 0)),
            scratch_shapes=[
                pltpu.VMEM((H, tq, hd), jnp.bfloat16),   # scaled Q (bf16)
                pltpu.VMEM((H, tq, 1), jnp.float32),     # running max
                pltpu.VMEM((H, tq, 1), jnp.float32),     # running sum
                pltpu.VMEM((H, tq, hd), jnp.float32),    # output accumulator
            ],
        ),
        compiler_params=pltpu.CompilerParams(
            dimension_semantics=("parallel", "parallel", "arbitrary"),
            vmem_limit_bytes=_VMEM_LIMIT),
    )(q, k, v)


# ---------------------------------------------------------------------------
# Full forward (matches PyTorch NonCausalSelfAttention.forward)
# ---------------------------------------------------------------------------
def non_causal_self_attention(x, w_attn, b_attn, w_proj, b_proj, *, n_head):
    """x: (B, T, C) f32.  w_attn: (3C, C), b_attn: (3C,),
    w_proj: (C, C), b_proj: (C,)  (PyTorch nn.Linear conventions)."""
    B, T, C = x.shape
    assert C % n_head == 0
    hd = C // n_head
    scale = 1.0 / math.sqrt(hd)

    # Weights pre-transposed (y = x @ W^T) and pre-cast to bf16 (once).
    w_attn_t = jnp.asarray(w_attn).T.astype(jnp.bfloat16)   # (C, 3C)
    w_proj_t = jnp.asarray(w_proj).T.astype(jnp.bfloat16)   # (C, C)
    b_attn_2d = jnp.asarray(b_attn, jnp.float32).reshape(1, 3 * C)
    b_proj_2d = jnp.asarray(b_proj, jnp.float32).reshape(1, C)

    # 1) QKV projection, batch folded into sublanes (lane-dense 3C output).
    x2d = x.reshape(B * T, C)
    qkv = _linear(x2d, w_attn_t, b_attn_2d, jnp.bfloat16)    # (B*T, 3C)

    # Layout plumbing (pure XLA transpose): split q/k/v and go head-major.
    qkv5 = qkv.reshape(B, T, 3, n_head, hd).transpose(2, 0, 3, 1, 4)
    q, k, v = qkv5[0], qkv5[1], qkv5[2]                      # (B, H, T, hd)

    # 2) Flash attention over (B, q-tiles, kv-tiles).
    tq = _pick_tile(T, 128)
    tk = _pick_tile(T, 128)
    y_heads = _flash_attention(q, k, v, scale=scale, tq=tq, tk=tk)

    # 3) Output projection on the re-merged (B*T, C) layout.
    y2d = y_heads.transpose(0, 2, 1, 3).reshape(B * T, C)
    out2d = _linear(y2d, w_proj_t, b_proj_2d, x.dtype)
    return out2d.reshape(B, T, C)


def _reference(x, w_attn, b_attn, w_proj, b_proj, n_head):
    """Pure-JAX f32 reference mirroring the PyTorch forward exactly."""
    B, T, C = x.shape
    hd = C // n_head
    qkv = x @ w_attn.T + b_attn                              # (B, T, 3C)
    q, k, v = jnp.split(qkv, 3, axis=2)
    q = q.reshape(B, T, n_head, hd).transpose(0, 2, 1, 3)
    k = k.reshape(B, T, n_head, hd).transpose(0, 2, 1, 3)
    v = v.reshape(B, T, n_head, hd).transpose(0, 2, 1, 3)
    att = (q @ k.transpose(0, 1, 3, 2)) * (1.0 / math.sqrt(hd))
    att = jax.nn.softmax(att, axis=-1)
    y = att @ v
    y = y.transpose(0, 2, 1, 3).reshape(B, T, C)
    return y @ w_proj.T + b_proj


if __name__ == "__main__":
    # config: n_embd=32, n_head=4; input B=2, T=8
    B, T, C, n_head = 2, 8, 32, 4

    key = jax.random.PRNGKey(0)
    kx, kw1, kb1, kw2, kb2 = jax.random.split(key, 5)

    x = jax.random.normal(kx, (B, T, C), dtype=jnp.float32)

    # deterministic nn.Linear-style init (scaled uniform)
    bound1 = 1.0 / math.sqrt(C)
    w_attn = jax.random.uniform(kw1, (3 * C, C), jnp.float32, -bound1, bound1)
    b_attn = jax.random.uniform(kb1, (3 * C,), jnp.float32, -bound1, bound1)
    w_proj = jax.random.uniform(kw2, (C, C), jnp.float32, -bound1, bound1)
    b_proj = jax.random.uniform(kb2, (C,), jnp.float32, -bound1, bound1)

    fwd = jax.jit(functools.partial(non_causal_self_attention, n_head=n_head))
    out = fwd(x, w_attn, b_attn, w_proj, b_proj)
    out = jax.block_until_ready(out)

    ref = _reference(x, w_attn, b_attn, w_proj, b_proj, n_head)
    assert out.shape == (B, T, C)
    # bf16 MXU operands + approx reciprocal -> compare with loosened tolerance
    assert jnp.allclose(out, ref, atol=5e-2, rtol=5e-2), "mismatch vs reference"

    print("KERNEL_OK")
</pallas_src>

<mosaic_0001>
module attributes {stable_mosaic.version = 11 : i64} {
  func.func @_linear_kernel(%arg0: i32, %arg1: memref<16x32xf32, #tpu.memory_space<vmem>>, %arg2: memref<32x96xbf16, #tpu.memory_space<vmem>>, %arg3: memref<1x96xf32, #tpu.memory_space<vmem>>, %arg4: memref<16x96xbf16, #tpu.memory_space<vmem>>) attributes {dimension_semantics = [#tpu.dimension_semantics<parallel>], iteration_bounds = array<i64: 1>, scalar_prefetch = 0 : i64, scratch_operands = 0 : i64, tpu.core_type = #tpu.core_type<tc>, window_params = [{transform_indices = @transform_0, window_bounds = array<i64: 16, 32>}, {pipeline_mode = #tpu.pipeline_mode<synchronous>, transform_indices = @transform_1, window_bounds = array<i64: 32, 96>}, {pipeline_mode = #tpu.pipeline_mode<synchronous>, transform_indices = @transform_2, window_bounds = array<i64: 1, 96>}, {transform_indices = @transform_3, window_bounds = array<i64: 16, 96>}]} {
    %c0 = arith.constant 0 : index
    %c0_0 = arith.constant 0 : index
    %0 = vector.load %arg1[%c0, %c0_0] : memref<16x32xf32, #tpu.memory_space<vmem>>, vector<16x32xf32>
    %1 = arith.truncf %0 : vector<16x32xf32> to vector<16x32xbf16>
    %c0_1 = arith.constant 0 : index
    %c0_2 = arith.constant 0 : index
    %2 = vector.load %arg2[%c0_1, %c0_2] : memref<32x96xbf16, #tpu.memory_space<vmem>>, vector<32x96xbf16>
    %cst = arith.constant dense<0.000000e+00> : vector<16x96xf32>
    %3 = tpu.matmul %1, %2, %cst {dimension_numbers = #tpu.dot_dimension_numbers<[1], [0], [0], [1], [0, 0, 1, 1], [], []>} : vector<16x32xbf16>, vector<32x96xbf16>, vector<16x96xf32> -> vector<16x96xf32>
    %c0_3 = arith.constant 0 : index
    %c0_4 = arith.constant 0 : index
    %4 = vector.load %arg3[%c0_3, %c0_4] : memref<1x96xf32, #tpu.memory_space<vmem>>, vector<1x96xf32>
    %5 = vector.broadcast %4 : vector<1x96xf32> to vector<16x96xf32>
    %6 = arith.addf %3, %5 : vector<16x96xf32>
    %7 = arith.truncf %6 : vector<16x96xf32> to vector<16x96xbf16>
    %c0_5 = arith.constant 0 : index
    %c0_6 = arith.constant 0 : index
    %8 = vector.load %arg4[%c0_5, %c0_6] : memref<16x96xbf16, #tpu.memory_space<vmem>>, vector<16x96xbf16>
    tpu.vector_store %arg4[%c0_5, %c0_6], %7 {strides = array<i32>} : memref<16x96xbf16, #tpu.memory_space<vmem>>, vector<16x96xbf16>,
    return
  }
  func.func @transform_0(%arg0: i32) -> (i32, i32) {
    %c0_i32 = arith.constant 0 : i32
    %c0_i32_0 = arith.constant 0 : i32
    return %arg0, %c0_i32 : i32, i32
  }
  func.func @transform_1(%arg0: i32) -> (i32, i32) {
    %c0_i32 = arith.constant 0 : i32
    %c0_i32_0 = arith.constant 0 : i32
    %c0_i32_1 = arith.constant 0 : i32
    return %c0_i32, %c0_i32_0 : i32, i32
  }
  func.func @transform_2(%arg0: i32) -> (i32, i32) {
    %c0_i32 = arith.constant 0 : i32
    %c0_i32_0 = arith.constant 0 : i32
    %c0_i32_1 = arith.constant 0 : i32
    return %c0_i32, %c0_i32_0 : i32, i32
  }
  func.func @transform_3(%arg0: i32) -> (i32, i32) {
    %c0_i32 = arith.constant 0 : i32
    %c0_i32_0 = arith.constant 0 : i32
    return %arg0, %c0_i32 : i32, i32
  }
}

module attributes {stable_mosaic.version = 11 : i64} {
  func.func @_flash_attn_kernel(%arg0: i32, %arg1: i32, %arg2: i32, %arg3: memref<1x4x8x8xbf16, #tpu.memory_space<vmem>>, %arg4: memref<1x4x8x8xbf16, #tpu.memory_space<vmem>>, %arg5: memref<1x4x8x8xbf16, #tpu.memory_space<vmem>>, %arg6: memref<1x4x8x8xbf16, #tpu.memory_space<vmem>>, %arg7: memref<4x8x8xbf16, #tpu.memory_space<vmem>>, %arg8: memref<4x8x1xf32, #tpu.memory_space<vmem>>, %arg9: memref<4x8x1xf32, #tpu.memory_space<vmem>>, %arg10: memref<4x8x8xf32, #tpu.memory_space<vmem>>) attributes {dimension_semantics = [#tpu.dimension_semantics<parallel>, #tpu.dimension_semantics<parallel>, #tpu.dimension_semantics<arbitrary>], iteration_bounds = array<i64: 2, 1, 1>, scalar_prefetch = 0 : i64, scratch_operands = 4 : i64, tpu.core_type = #tpu.core_type<tc>, window_params = [{transform_indices = @transform_0, window_bounds = array<i64: 1, 4, 8, 8>}, {transform_indices = @transform_1, window_bounds = array<i64: 1, 4, 8, 8>}, {transform_indices = @transform_2, window_bounds = array<i64: 1, 4, 8, 8>}, {transform_indices = @transform_3, window_bounds = array<i64: 1, 4, 8, 8>}]} {
    %c0_i32 = arith.constant 0 : i32
    %0 = arith.cmpi eq, %arg2, %c0_i32 : i32
    %1 = arith.extui %0 : i1 to i32
    %c0_i32_0 = arith.constant 0 : i32
    %2 = arith.cmpi ne, %1, %c0_i32_0 : i32
    scf.if %2 {
      %c0_34 = arith.constant 0 : index
      %c0_35 = arith.constant 0 : index
      %c0_36 = arith.constant 0 : index
      %c0_37 = arith.constant 0 : index
      %35 = vector.load %arg3[%c0_34, %c0_35, %c0_36, %c0_37] : memref<1x4x8x8xbf16, #tpu.memory_space<vmem>>, vector<1x4x8x8xbf16>
      %36 = vector.shape_cast %35 : vector<1x4x8x8xbf16> to vector<4x8x8xbf16>
      %cst_38 = arith.constant 3.535160e-01 : bf16
      %37 = vector.broadcast %cst_38 : bf16 to vector<4x8x8xbf16>
      %38 = arith.mulf %36, %37 : vector<4x8x8xbf16>
      %c0_39 = arith.constant 0 : index
      %c0_40 = arith.constant 0 : index
      %c0_41 = arith.constant 0 : index
      %39 = vector.load %arg7[%c0_39, %c0_40, %c0_41] : memref<4x8x8xbf16, #tpu.memory_space<vmem>>, vector<4x8x8xbf16>
      tpu.vector_store %arg7[%c0_39, %c0_40, %c0_41], %38 {strides = array<i32>} : memref<4x8x8xbf16, #tpu.memory_space<vmem>>, vector<4x8x8xbf16>,
      %cst_42 = arith.constant 0xFF800000 : f32
      %40 = vector.broadcast %cst_42 : f32 to vector<4x8x1xf32>
      %c0_43 = arith.constant 0 : index
      %c0_44 = arith.constant 0 : index
      %c0_45 = arith.constant 0 : index
      %41 = vector.load %arg8[%c0_43, %c0_44, %c0_45] : memref<4x8x1xf32, #tpu.memory_space<vmem>>, vector<4x8x1xf32>
      tpu.vector_store %arg8[%c0_43, %c0_44, %c0_45], %40 {strides = array<i32>} : memref<4x8x1xf32, #tpu.memory_space<vmem>>, vector<4x8x1xf32>,
      %cst_46 = arith.constant 0.000000e+00 : f32
      %42 = vector.broadcast %cst_46 : f32 to vector<4x8x1xf32>
      %c0_47 = arith.constant 0 : index
      %c0_48 = arith.constant 0 : index
      %c0_49 = arith.constant 0 : index
      %43 = vector.load %arg9[%c0_47, %c0_48, %c0_49] : memref<4x8x1xf32, #tpu.memory_space<vmem>>, vector<4x8x1xf32>
      tpu.vector_store %arg9[%c0_47, %c0_48, %c0_49], %42 {strides = array<i32>} : memref<4x8x1xf32, #tpu.memory_space<vmem>>, vector<4x8x1xf32>,
      %cst_50 = arith.constant 0.000000e+00 : f32
      %44 = vector.broadcast %cst_50 : f32 to vector<4x8x8xf32>
      %c0_51 = arith.constant 0 : index
      %c0_52 = arith.constant 0 : index
      %c0_53 = arith.constant 0 : index
      %45 = vector.load %arg10[%c0_51, %c0_52, %c0_53] : memref<4x8x8xf32, #tpu.memory_space<vmem>>, vector<4x8x8xf32>
      tpu.vector_store %arg10[%c0_51, %c0_52, %c0_53], %44 {strides = array<i32>} : memref<4x8x8xf32, #tpu.memory_space<vmem>>, vector<4x8x8xf32>,
    } else {
    }
    %c0 = arith.constant 0 : index
    %c0_1 = arith.constant 0 : index
    %c0_2 = arith.constant 0 : index
    %c0_3 = arith.constant 0 : index
    %3 = vector.load %arg4[%c0, %c0_1, %c0_2, %c0_3] : memref<1x4x8x8xbf16, #tpu.memory_space<vmem>>, vector<1x4x8x8xbf16>
    %4 = vector.shape_cast %3 : vector<1x4x8x8xbf16> to vector<4x8x8xbf16>
    %c0_4 = arith.constant 0 : index
    %c0_5 = arith.constant 0 : index
    %c0_6 = arith.constant 0 : index
    %c0_7 = arith.constant 0 : index
    %5 = vector.load %arg5[%c0_4, %c0_5, %c0_6, %c0_7] : memref<1x4x8x8xbf16, #tpu.memory_space<vmem>>, vector<1x4x8x8xbf16>
    %6 = vector.shape_cast %5 : vector<1x4x8x8xbf16> to vector<4x8x8xbf16>
    %c0_8 = arith.constant 0 : index
    %c0_9 = arith.constant 0 : index
    %c0_10 = arith.constant 0 : index
    %7 = vector.load %arg7[%c0_8, %c0_9, %c0_10] : memref<4x8x8xbf16, #tpu.memory_space<vmem>>, vector<4x8x8xbf16>
    "tpu.trace_start"() <{level = 10 : i32, message = "hqd,hkd->hqk"}> : () -> ()
    %cst = arith.constant dense<0.000000e+00> : vector<4x8x8xf32>
    %8 = tpu.matmul %7, %4, %cst {dimension_numbers = #tpu.dot_dimension_numbers<[2], [2], [1], [1], [0, 0, 0, 1, 1, 1], [0], [0]>} : vector<4x8x8xbf16>, vector<4x8x8xbf16>, vector<4x8x8xf32> -> vector<4x8x8xf32>
    "tpu.trace_stop"() : () -> ()
    %c0_11 = arith.constant 0 : index
    %c0_12 = arith.constant 0 : index
    %c0_13 = arith.constant 0 : index
    %9 = vector.load %arg8[%c0_11, %c0_12, %c0_13] : memref<4x8x1xf32, #tpu.memory_space<vmem>>, vector<4x8x1xf32>
    %cst_14 = arith.constant dense<0xFF800000> : vector<4x8xf32>
    %10 = vector.multi_reduction <maximumf>, %8, %cst_14 [2] : vector<4x8x8xf32> to vector<4x8xf32>
    %11 = vector.shape_cast %10 : vector<4x8xf32> to vector<4x8x1xf32>
    %12 = arith.maximumf %9, %11 : vector<4x8x1xf32>
    %13 = arith.subf %9, %12 : vector<4x8x1xf32>
    %14 = math.exp %13 : vector<4x8x1xf32>
    %15 = vector.broadcast %12 : vector<4x8x1xf32> to vector<4x8x8xf32>
    %16 = arith.subf %8, %15 : vector<4x8x8xf32>
    %17 = math.exp %16 : vector<4x8x8xf32>
    %c0_15 = arith.constant 0 : index
    %c0_16 = arith.constant 0 : index
    %c0_17 = arith.constant 0 : index
    %18 = vector.load %arg9[%c0_15, %c0_16, %c0_17] : memref<4x8x1xf32, #tpu.memory_space<vmem>>, vector<4x8x1xf32>
    %19 = arith.mulf %14, %18 : vector<4x8x1xf32>
    %cst_18 = arith.constant dense<0.000000e+00> : vector<4x8xf32>
    %20 = vector.multi_reduction <add>, %17, %cst_18 [2] : vector<4x8x8xf32> to vector<4x8xf32>
    %21 = vector.shape_cast %20 : vector<4x8xf32> to vector<4x8x1xf32>
    %22 = arith.addf %19, %21 : vector<4x8x1xf32>
    %c0_19 = arith.constant 0 : index
    %c0_20 = arith.constant 0 : index
    %c0_21 = arith.constant 0 : index
    %23 = vector.load %arg9[%c0_19, %c0_20, %c0_21] : memref<4x8x1xf32, #tpu.memory_space<vmem>>, vector<4x8x1xf32>
    tpu.vector_store %arg9[%c0_19, %c0_20, %c0_21], %22 {strides = array<i32>} : memref<4x8x1xf32, #tpu.memory_space<vmem>>, vector<4x8x1xf32>,
    %c0_22 = arith.constant 0 : index
    %c0_23 = arith.constant 0 : index
    %c0_24 = arith.constant 0 : index
    %24 = vector.load %arg10[%c0_22, %c0_23, %c0_24] : memref<4x8x8xf32, #tpu.memory_space<vmem>>, vector<4x8x8xf32>
    %25 = vector.broadcast %14 : vector<4x8x1xf32> to vector<4x8x8xf32>
    %26 = arith.mulf %25, %24 : vector<4x8x8xf32>
    %27 = arith.truncf %17 : vector<4x8x8xf32> to vector<4x8x8xbf16>
    "tpu.trace_start"() <{level = 10 : i32, message = "hqk,hkd->hqd"}> : () -> ()
    %cst_25 = arith.constant dense<0.000000e+00> : vector<4x8x8xf32>
    %28 = tpu.matmul %27, %6, %cst_25 {dimension_numbers = #tpu.dot_dimension_numbers<[2], [1], [1], [2], [0, 0, 0, 1, 1, 2], [0], [0]>} : vector<4x8x8xbf16>, vector<4x8x8xbf16>, vector<4x8x8xf32> -> vector<4x8x8xf32>
    "tpu.trace_stop"() : () -> ()
    %29 = arith.addf %26, %28 : vector<4x8x8xf32>
    %c0_26 = arith.constant 0 : index
    %c0_27 = arith.constant 0 : index
    %c0_28 = arith.constant 0 : index
    %30 = vector.load %arg10[%c0_26, %c0_27, %c0_28] : memref<4x8x8xf32, #tpu.memory_space<vmem>>, vector<4x8x8xf32>
    tpu.vector_store %arg10[%c0_26, %c0_27, %c0_28], %29 {strides = array<i32>} : memref<4x8x8xf32, #tpu.memory_space<vmem>>, vector<4x8x8xf32>,
    %c0_29 = arith.constant 0 : index
    %c0_30 = arith.constant 0 : index
    %c0_31 = arith.constant 0 : index
    %31 = vector.load %arg8[%c0_29, %c0_30, %c0_31] : memref<4x8x1xf32, #tpu.memory_space<vmem>>, vector<4x8x1xf32>
    tpu.vector_store %arg8[%c0_29, %c0_30, %c0_31], %12 {strides = array<i32>} : memref<4x8x1xf32, #tpu.memory_space<vmem>>, vector<4x8x1xf32>,
    %c0_i32_32 = arith.constant 0 : i32
    %32 = arith.cmpi eq, %arg2, %c0_i32_32 : i32
    %33 = arith.extui %32 : i1 to i32
    %c0_i32_33 = arith.constant 0 : i32
    %34 = arith.cmpi ne, %33, %c0_i32_33 : i32
    scf.if %34 {
      %c0_34 = arith.constant 0 : index
      %c0_35 = arith.constant 0 : index
      %c0_36 = arith.constant 0 : index
      %35 = vector.load %arg9[%c0_34, %c0_35, %c0_36] : memref<4x8x1xf32, #tpu.memory_space<vmem>>, vector<4x8x1xf32>
      %36 = tpu.reciprocal %35 {approx = true} : vector<4x8x1xf32> -> vector<4x8x1xf32>
      %c0_37 = arith.constant 0 : index
      %c0_38 = arith.constant 0 : index
      %c0_39 = arith.constant 0 : index
      %37 = vector.load %arg10[%c0_37, %c0_38, %c0_39] : memref<4x8x8xf32, #tpu.memory_space<vmem>>, vector<4x8x8xf32>
      %38 = vector.broadcast %36 : vector<4x8x1xf32> to vector<4x8x8xf32>
      %39 = arith.mulf %37, %38 : vector<4x8x8xf32>
      %40 = arith.truncf %39 : vector<4x8x8xf32> to vector<4x8x8xbf16>
      %c0_40 = arith.constant 0 : index
      %c0_41 = arith.constant 0 : index
      %c0_42 = arith.constant 0 : index
      %c0_43 = arith.constant 0 : index
      %41 = vector.load %arg6[%c0_40, %c0_41, %c0_42, %c0_43] : memref<1x4x8x8xbf16, #tpu.memory_space<vmem>>, vector<1x4x8x8xbf16>
      %42 = vector.shape_cast %41 : vector<1x4x8x8xbf16> to vector<4x8x8xbf16>
      %43 = vector.shape_cast %40 : vector<4x8x8xbf16> to vector<1x4x8x8xbf16>
      tpu.vector_store %arg6[%c0_40, %c0_41, %c0_42, %c0_43], %43 {strides = array<i32>} : memref<1x4x8x8xbf16, #tpu.memory_space<vmem>>, vector<1x4x8x8xbf16>,
    } else {
    }
    return
  }
  func.func @transform_0(%arg0: i32, %arg1: i32, %arg2: i32) -> (i32, i32, i32, i32) {
    %c0_i32 = arith.constant 0 : i32
    %c0_i32_0 = arith.constant 0 : i32
    %c0_i32_1 = arith.constant 0 : i32
    return %arg0, %c0_i32, %arg1, %c0_i32_0 : i32, i32, i32, i32
  }
  func.func @transform_1(%arg0: i32, %arg1: i32, %arg2: i32) -> (i32, i32, i32, i32) {
    %c0_i32 = arith.constant 0 : i32
    %c0_i32_0 = arith.constant 0 : i32
    %c0_i32_1 = arith.constant 0 : i32
    return %arg0, %c0_i32, %arg2, %c0_i32_0 : i32, i32, i32, i32
  }
  func.func @transform_2(%arg0: i32, %arg1: i32, %arg2: i32) -> (i32, i32, i32, i32) {
    %c0_i32 = arith.constant 0 : i32
    %c0_i32_0 = arith.constant 0 : i32
    %c0_i32_1 = arith.constant 0 : i32
    return %arg0, %c0_i32, %arg2, %c0_i32_0 : i32, i32, i32, i32
  }
  func.func @transform_3(%arg0: i32, %arg1: i32, %arg2: i32) -> (i32, i32, i32, i32) {
    %c0_i32 = arith.constant 0 : i32
    %c0_i32_0 = arith.constant 0 : i32
    %c0_i32_1 = arith.constant 0 : i32
    return %arg0, %c0_i32, %arg1, %c0_i32_0 : i32, i32, i32, i32
  }
}

module attributes {stable_mosaic.version = 11 : i64} {
  func.func @_linear_kernel(%arg0: i32, %arg1: memref<16x32xbf16, #tpu.memory_space<vmem>>, %arg2: memref<32x32xbf16, #tpu.memory_space<vmem>>, %arg3: memref<1x32xf32, #tpu.memory_space<vmem>>, %arg4: memref<16x32xf32, #tpu.memory_space<vmem>>) attributes {dimension_semantics = [#tpu.dimension_semantics<parallel>], iteration_bounds = array<i64: 1>, scalar_prefetch = 0 : i64, scratch_operands = 0 : i64, tpu.core_type = #tpu.core_type<tc>, window_params = [{transform_indices = @transform_0, window_bounds = array<i64: 16, 32>}, {pipeline_mode = #tpu.pipeline_mode<synchronous>, transform_indices = @transform_1, window_bounds = array<i64: 32, 32>}, {pipeline_mode = #tpu.pipeline_mode<synchronous>, transform_indices = @transform_2, window_bounds = array<i64: 1, 32>}, {transform_indices = @transform_3, window_bounds = array<i64: 16, 32>}]} {
    %c0 = arith.constant 0 : index
    %c0_0 = arith.constant 0 : index
    %0 = vector.load %arg1[%c0, %c0_0] : memref<16x32xbf16, #tpu.memory_space<vmem>>, vector<16x32xbf16>
    %c0_1 = arith.constant 0 : index
    %c0_2 = arith.constant 0 : index
    %1 = vector.load %arg2[%c0_1, %c0_2] : memref<32x32xbf16, #tpu.memory_space<vmem>>, vector<32x32xbf16>
    %cst = arith.constant dense<0.000000e+00> : vector<16x32xf32>
    %2 = tpu.matmul %0, %1, %cst {dimension_numbers = #tpu.dot_dimension_numbers<[1], [0], [0], [1], [0, 0, 1, 1], [], []>} : vector<16x32xbf16>, vector<32x32xbf16>, vector<16x32xf32> -> vector<16x32xf32>
    %c0_3 = arith.constant 0 : index
    %c0_4 = arith.constant 0 : index
    %3 = vector.load %arg3[%c0_3, %c0_4] : memref<1x32xf32, #tpu.memory_space<vmem>>, vector<1x32xf32>
    %4 = vector.broadcast %3 : vector<1x32xf32> to vector<16x32xf32>
    %5 = arith.addf %2, %4 : vector<16x32xf32>
    %c0_5 = arith.constant 0 : index
    %c0_6 = arith.constant 0 : index
    %6 = vector.load %arg4[%c0_5, %c0_6] : memref<16x32xf32, #tpu.memory_space<vmem>>, vector<16x32xf32>
    tpu.vector_store %arg4[%c0_5, %c0_6], %5 {strides = array<i32>} : memref<16x32xf32, #tpu.memory_space<vmem>>, vector<16x32xf32>,
    return
  }
  func.func @transform_0(%arg0: i32) -> (i32, i32) {
    %c0_i32 = arith.constant 0 : i32
    %c0_i32_0 = arith.constant 0 : i32
    return %arg0, %c0_i32 : i32, i32
  }
  func.func @transform_1(%arg0: i32) -> (i32, i32) {
    %c0_i32 = arith.constant 0 : i32
    %c0_i32_0 = arith.constant 0 : i32
    %c0_i32_1 = arith.constant 0 : i32
    return %c0_i32, %c0_i32_0 : i32, i32
  }
  func.func @transform_2(%arg0: i32) -> (i32, i32) {
    %c0_i32 = arith.constant 0 : i32
    %c0_i32_0 = arith.constant 0 : i32
    %c0_i32_1 = arith.constant 0 : i32
    return %c0_i32, %c0_i32_0 : i32, i32
  }
  func.func @transform_3(%arg0: i32) -> (i32, i32) {
    %c0_i32 = arith.constant 0 : i32
    %c0_i32_0 = arith.constant 0 : i32
    return %arg0, %c0_i32 : i32, i32
  }
}

</mosaic_0001>

<bundles_post_ra>
// kernel: non_causal_self_attention.3
= control target key start
LH: loop header
LB: loop body
LE: loop exit
PB: predicated region body
PF: predicated region fallthrough
CT: control target
= control target key end

     0   :  { %v124_v0 = vmov 0.0   ;;  %vm125_vm0 = vmmov 0   ;;  %vm41_vm1 = vcmask 261120   ;;  %vm94_vm2 = vcmask 781312   ;;  %s167_s1 = inlined_call_operand.vmem [shape: bf16[32,96], index: 1, kind: input, shape index: {}]   ;;  %s168_s0 = inlined_call_operand.vmem [shape: f32[16,32], index: 0, kind: input, shape index: {}]   ;;  %s169_s2 = inlined_call_operand.vmem [shape: f32[1,96], index: 2, kind: input, shape index: {}]   ;;  %s170_s3 = inlined_call_operand.vmem [shape: bf16[16,96], index: 3, kind: output, shape index: {}]  }
   0x1   :  { %112 = vmatprep.subr.bf16.mxu0 %v124_v0  ;;  %v122_v1 = vld [vmem:[%s167_s1] sm:$0xff]   ;;  %116 = vmatprep.mubr.msk.bf16.mxu0 %vm125_vm0, %v124_v0  ;;  %v123_v2 = vld [vmem:[%s167_s1 + $0x8] sm:$0xff]  }
   0x2   :  { %113 = vmatpush3.bf16.msra.mxu0 %v122_v1  ;;  %v15_v3 = vld [vmem:[%s168_s0] sm:$0xff]  ;;  %v16_v4 = vld [vmem:[%s168_s0 + $0x8] sm:$0xff] }
   0x3   :  { %114 = vmatprep.subr.bf16.mxu0 %v124_v0  ;;  %v17_v5 = vpack.c.bf16 %v16_v4, %v15_v3  ;;  %v101_v6 = vld [vmem:[%s169_s2] ss:$0 sm:$0xff] }
   0x6   :  { %115 = vmatpush3.bf16.msra.mxu0 %v123_v2 }
   0x9   :  { %117 = vmatmul.mubr.msk.bf16.vlgmr.msra.gmra.mrb[0].mxu0 %vm41_vm1, %v17_v5 }
  0xdc   :  { %v79_v7 = vpop.f32.mrb[0].mxu0 }
  0xdd   :  { %v80_v8 = vadd.f32 %v101_v6, %v79_v7  ;;  %v118_v9 = vpop.f32.mrb[1].mxu0 }
  0xde   :  { %v82_v10 = vpop.f32.mrb[2].mxu0 }
  0xdf   :  { %v107_v11 = vpack.c.bf16 %v80_v8, %v80_v8  ;;  %v83_v12 = vadd.f32 %v101_v6, %v82_v10  ;;  %v119_v13 = vpop.f32.mrb[3].mxu0 }
  0xe1   :  { %95 = vst.msk [vmem:[%s170_s3] sm:$0xf] %vm94_vm2, %v107_v11  ;;  %v108_v14 = vpack.c.bf16 %v83_v12, %v83_v12 }
  0xe3   :  { %96 = vst.msk [vmem:[%s170_s3 + $0x4] sm:$0xf] %vm94_vm2, %v108_v14 }

// kernel: non_causal_self_attention.5
= control target key start
LH: loop header
LB: loop body
LE: loop exit
PB: predicated region body
PF: predicated region fallthrough
CT: control target
= control target key end

     0   :  { %v157_v1 = vmov 0.0   ;;  %vm158_vm0 = vmmov 0   ;;  %s206_s0 = inlined_call_operand.vmem [shape: bf16[16,32], index: 0, kind: input, shape index: {}]   ;;  %s207_s1 = inlined_call_operand.vmem [shape: bf16[32,32], index: 1, kind: input, shape index: {}]   ;;  %s208_s2 = inlined_call_operand.vmem [shape: f32[1,32], index: 2, kind: input, shape index: {}]   ;;  %s209_s3 = inlined_call_operand.hbm [shape: f32[16,32], index: 3, kind: output, shape index: {}]  }
   0x1   :  { %v130_v0 = vld [vmem:[%s207_s1] sm:$0xff]   ;;  %117 = vmatprep.subr.bf16.mxu0 %v157_v1  ;;  %v131_v2 = vld [vmem:[%s207_s1 + $0x8] sm:$0xff]   ;;  %121 = vmatprep.mubr.msk.bf16.mxu0 %vm158_vm0, %v157_v1 }
   0x2   :  { %118 = vmatpush3.bf16.msra.mxu0 %v130_v0 }
   0x3   :  { %119 = vmatprep.subr.bf16.mxu0 %v157_v1 }
   0x4   :  { %8 = vsyncpa [#allocation3], 0  ;;  %v132_v3 = vld [vmem:[%s206_s0] sm:$0xff]   ;;  %vm46_vm1 = vcmask 261120   ;;  %s159_s20 = smov [#allocation2]  }
   0x5   :  { %v109_v4 = vld [vmem:[%s208_s2] ss:$0 sm:$0xff]  ;;  %s98_s21 = sshll.u32 %s159_s20, 4  ;;  %s99_s21 = int_to_ptr.vmem [resolvable:$true] %s98_s21 }
   0x6   :  { %120 = vmatpush3.bf16.msra.mxu0 %v131_v2  ;;  %s133_s1 = scalar_lea.vmem %s99_s21, 256  ;;  %p138_p1 = scmp.lt.s32.totalorder %s99_s21, %s99_s21 }
   0x7   :  { %p134_p0 = scmp.ne.s32.totalorder %s99_s21, %s133_s1  ;;  %p139_p2 = scmp.lt.s32.totalorder %s133_s1, %s133_s1 }
   0x9   :  { %122 = vmatmul.mubr.msk.bf16.vlgmr.msra.gmra.mrb[0].mxu0 %vm46_vm1, %v132_v3  ;;  %p140_p3 = por %p139_p2, %p138_p1 }
   0xb   :  { %p141_p4 = pnand %p140_p3, %p134_p0 }
  0xdc   :  { %v84_v5 = vpop.f32.mrb[0].mxu0 }
  0xdd   :  { %v85_v6 = vadd.f32 %v109_v4, %v84_v5  ;;  %v123_v7 = vpop.f32.mrb[1].mxu0 }
  0xde   :  { %v87_v8 = vpop.f32.mrb[2].mxu0 }
  0xdf   :  { %91 = vst.msk [vmem:[#allocation2] sm:$0xff] %vm46_vm1, %v85_v6  ;;  %v88_v9 = vadd.f32 %v109_v4, %v87_v8  ;;  %v124_v10 = vpop.f32.mrb[3].mxu0 }
  0xe1   :  { %92 = vst.msk [vmem:[#allocation2 + $0x8] sm:$0xff] %vm46_vm1, %v88_v9 }
  0xe2   :  { %144 = shalt.err (!%p141_p4)
}
  0xe3   :  { %s145_s22 = scalar_lea.hbm %s209_s3, 256 }
  0xe4   :  { %p146_p5 = scmp.ne.s32.totalorder %s209_s3, %s145_s22  ;;  %p149_p6 = scmp.lt.u32.totalorder %s145_s22, %s209_s3 }
  0xe6   :  { %p151_p7 = pnand %p149_p6, %p146_p5 }
  0xe8   :  { %154 = shalt.err (!%p151_p7)
}
  0xe9   :  { %s160_s27 = smov 128   ;;  %s161_s28 = smov 8  }
  0xea   :  { %104 = dma.vmem_to_hbm [thread:$0]  %s99_s21, 256, %s209_s3, [#allocation3], %s160_s27, %s160_s27, %s161_s28  }
  0xeb   :  { %155 = dma.done.wait [#allocation3], 256  }
  0xec   :  { %156 = vsyncadd [#allocation3], 4294967040 }
  0xed   :  { %108 = vsyncpa [#allocation3], 1 }

// kernel: non_causal_self_attention.4
= control target key start
LH: loop header
LB: loop body
LE: loop exit
PB: predicated region body
PF: predicated region fallthrough
CT: control target
= control target key end

     0   :  { %s1186_s12 = smov 0   ;;  %s1188_s13 = smov 0   ;;  %s1376_s0 = inlined_call_operand.vmem [shape: bf16[2,4,8,8], index: 0, kind: input, shape index: {}]   ;;  %s1377_s1 = inlined_call_operand.vmem [shape: bf16[2,4,8,8], index: 1, kind: input, shape index: {}]   ;;  %s1378_s2 = inlined_call_operand.vmem [shape: bf16[2,4,8,8], index: 2, kind: input, shape index: {}]   ;;  %s1379_s3 = inlined_call_operand.vmem [shape: bf16[2,4,8,8], index: 3, kind: output, shape index: {}]  }
   0x1   :  { %s1190_s14 = smov 0  }
   0x2 LB: > { %s32_s15 = sadd.s32 1, %s1156_s13  ;;  %p997_p0 = scmp.ge.s32.totalorder %s1160_s14, 1  ;;  %s1160_s14 = sphi %s1190_s14, %s13_s14   ;;  %s1156_s13 = sphi %s1188_s13, %s1381_s13   ;;  %s1152_s12 = sphi %s1186_s12, %s1380_s12  }
   0x3   : > { %p34_p1 = scmp.ge.s32.totalorder %s32_s15, 2  ;;  %p193_p2 = scmp.lt.s32.totalorder %s1160_s14, 3 }
   0x5   : > { %s1383_s15 = smov (%p34_p1, %s32_s15), 0  ;;  %p194_p3 = pnand %p997_p0, %p193_p2 }
   0x6   : > { %p239_p4 = scmp.lt.s32.totalorder (!%p194_p3), %s1152_s12, 1  ;;  %vm299_vm0 = vcmask (!%p194_p3), 64512   ;;  %v1162_v0 = vmov (!%p194_p3), 0.0   ;;  %vm1163_vm1 = vmmov (!%p194_p3), 0   ;;  %vm285_vm2 = vcmask (!%p194_p3), 60416  }
   0x7   : > { %197 = sbr.rel (%p194_p3) target bundleno = 837 (0x345), region = 32  ;;  %1036 = vmatprep.subr.bf16.mxu0 (!%p194_p3), %v1162_v0  ;;  %300 = vst.msk [vmem:[#allocation5] sm:$0xff] (!%p194_p3), %vm299_vm0, %v1162_v0  ;;  %301 = vst.msk [vmem:[#allocation5 + $0x8] sm:$0xff] (!%p194_p3), %vm299_vm0, %v1162_v0  ;;  %1042 = vmatprep.subr.bf16.mxu1 (!%p194_p3), %v1162_v0  ;;  %vm290_vm3 = vcmask (!%p194_p3), 7168   ;;  %v1164_v21 = vmov (!%p194_p3), -inf   ;;  %v1165_v42 = vmov (!%p194_p3), 0  }
   0x8   : > { %302 = vst.msk [vmem:[#allocation5 + $0x10] sm:$0xff] (!%p194_p3), %vm299_vm0, %v1162_v0  ;;  %303 = vst.msk [vmem:[#allocation5 + $0x18] sm:$0xff] (!%p194_p3), %vm299_vm0, %v1162_v0  ;;  %1038 = vmatprep.mubr.msk.bf16.mxu0 (!%p194_p3), %vm1163_vm1, %v1162_v0  ;;  %1044 = vmatprep.mubr.msk.bf16.mxu1 (!%p194_p3), %vm1163_vm1, %v1162_v0  ;;  %vm629_vm4 = vcmask (!%p194_p3), 1043456  }
   0x9   : > { %291 = vst.msk [vmem:[#allocation3] sm:$0xff] (!%p194_p3), %vm290_vm3, %v1164_v21  ;;  %292 = vst.msk [vmem:[#allocation3 + $0x8] sm:$0xff] (!%p194_p3), %vm290_vm3, %v1164_v21  ;;  %1112 = vset.pattern.permute.xlu0 (!%p194_p3), %v1165_v42  ;;  %1113 = vset.pattern.permute.xlu1 (!%p194_p3), %v1165_v42 }
   0xa   : > { %293 = vst.msk [vmem:[#allocation3 + $0x10] sm:$0xff] (!%p194_p3), %vm290_vm3, %v1164_v21  ;;  %294 = vst.msk [vmem:[#allocation3 + $0x18] sm:$0xff] (!%p194_p3), %vm290_vm3, %v1164_v21 }
   0xb   : > { %295 = vst.msk [vmem:[#allocation4] sm:$0xff] (!%p194_p3), %vm290_vm3, %v1162_v0  ;;  %296 = vst.msk [vmem:[#allocation4 + $0x8] sm:$0xff] (!%p194_p3), %vm290_vm3, %v1162_v0 }
   0xc   : > { %297 = vst.msk [vmem:[#allocation4 + $0x10] sm:$0xff] (!%p194_p3), %vm290_vm3, %v1162_v0  ;;  %298 = vst.msk [vmem:[#allocation4 + $0x18] sm:$0xff] (!%p194_p3), %vm290_vm3, %v1162_v0 }
   0xe   : > { %s1385_s12 = smov (!%p239_p4, %s1152_s12), 1 }
   0xf   : > { %s1218_s16 = sshll.u32 %s1385_s12, 4 }
  0x10   : > { %s246_s19 = scalar_lea.vmem %s1376_s0, %s1218_s16  ;;  %s254_s22 = scalar_lea.vmem %s1377_s1, %s1218_s16  ;;  %v1280_v43 = vld [vmem:[#allocation3] sm:$0xff]  ;;  %v1285_v46 = vld [vmem:[#allocation3 + $0x8] sm:$0xff] }
  0x11   : > { %v277_v1 = vld [vmem:[%s246_s19] sm:$0xf]  ;;  %v278_v2 = vld [vmem:[%s246_s19 + $0x4] sm:$0xf]  ;;  %v279_v3 = vld [vmem:[%s246_s19 + $0x8] sm:$0xf]  ;;  %s262_s25 = scalar_lea.vmem %s1378_s2, %s1218_s16  ;;  %s270_s28 = scalar_lea.vmem %s1379_s3, %s1218_s16 }
  0x12   : > { %v280_v4 = vld [vmem:[%s246_s19 + $0xc] sm:$0xf]  ;;  %v281_v5 = vmul.bf16 1052065461, %v277_v1  ;;  %v282_v6 = vmul.bf16 1052065461, %v278_v2 }
  0x13   : > { %v283_v7 = vmul.bf16 1052065461, %v279_v3  ;;  %v284_v8 = vmul.bf16 1052065461, %v280_v4  ;;  %v304_v9 = vld [vmem:[%s254_s22] sm:$0xf] }
  0x14   : > { %286 = vst.msk [vmem:[#allocation2] sm:$0xf] %vm285_vm2, %v281_v5  ;;  %287 = vst.msk [vmem:[#allocation2 + $0x4] sm:$0xf] %vm285_vm2, %v282_v6  ;;  %v321_v10 = vsel %vm299_vm0, %v304_v9, 0  ;;  %v1295_v50 = vld [vmem:[#allocation3 + $0x10] sm:$0xff] }
  0x15   : > { %v305_v11 = vld [vmem:[%s254_s22 + $0x4] sm:$0xf]  ;;  %288 = vst.msk [vmem:[#allocation2 + $0x8] sm:$0xf] %vm285_vm2, %v283_v7  ;;  %289 = vst.msk [vmem:[#allocation2 + $0xc] sm:$0xf] %vm285_vm2, %v284_v8  ;;  %1037 = vmatpush3.bf16.xpose.msra.mxu0 %v321_v10 }
  0x16   : > { %v367_v12 = vsel %vm299_vm0, %v305_v11, 0  ;;  %1048 = vmatprep.subr.bf16.mxu0 %v1162_v0  ;;  %v306_v13 = vld [vmem:[%s254_s22 + $0x8] sm:$0xf]  ;;  %v307_v14 = vld [vmem:[%s254_s22 + $0xc] sm:$0xf]  ;;  %v567_v42 = vld [vmem:[#allocation4 + $0x10] sm:$0xff] }
  0x17   : > { %1043 = vmatpush3.bf16.xpose.msra.mxu1 %v367_v12  ;;  %v413_v15 = vsel %vm299_vm0, %v306_v13, 0  ;;  %v459_v18 = vsel %vm299_vm0, %v307_v14, 0  ;;  %v1305_v54 = vld [vmem:[#allocation3 + $0x18] sm:$0xff]  ;;  %v308_v59 = vld [vmem:[%s262_s25] sm:$0xf] }
  0x18   : > { %1054 = vmatprep.subr.bf16.mxu1 %v1162_v0  ;;  %v631_v60 = vsel %vm629_vm4, %v308_v59, 0  ;;  %v309_v61 = vld [vmem:[%s262_s25 + $0x4] sm:$0xf]  ;;  %v310_v63 = vld [vmem:[%s262_s25 + $0x8] sm:$0xf]  ;;  %v594_v59 = vld [vmem:[#allocation5] sm:$0xff] }
  0x19   : > { %v677_v62 = vsel %vm629_vm4, %v309_v61, 0  ;;  %v723_v1 = vsel %vm629_vm4, %v310_v63, 0  ;;  %v311_v2 = vld [vmem:[%s262_s25 + $0xc] sm:$0xf] }
  0x1a   : > { %v769_v3 = vsel %vm629_vm4, %v311_v2, 0 }
  0x1b   : > { %v312_v16 = vld [vmem:[#allocation2] sm:$0xf]  ;;  %v313_v17 = vld [vmem:[#allocation2 + $0x4] sm:$0xf] }
  0x1c   : > { %1039 = vmatmul.mubr.msk.bf16.vlgmr.msra.gmra.mrb[0].mxu0 %vm299_vm0, %v312_v16  ;;  %v314_v19 = vld [vmem:[#allocation2 + $0x8] sm:$0xf]  ;;  %v315_v20 = vld [vmem:[#allocation2 + $0xc] sm:$0xf] }
  0x1d   : > { %1049 = vmatpush3.bf16.xpose.msra.mxu0 %v413_v15  ;;  %1050 = vmatprep.mubr.msk.bf16.mxu0 %vm1163_vm1, %v1162_v0 }
  0x1e   : > { %1045 = vmatmul.mubr.msk.bf16.vlgmr.msra.gmra.mrb[0].mxu1 %vm299_vm0, %v313_v17  ;;  %1060 = vmatprep.subr.bf16.mxu0 %v1162_v0 }
  0x1f   : > { %1055 = vmatpush3.bf16.xpose.msra.mxu1 %v459_v18  ;;  %1056 = vmatprep.mubr.msk.bf16.mxu1 %vm1163_vm1, %v1162_v0 }
  0x20   : > { %1066 = vmatprep.subr.bf16.mxu1 %v1162_v0 }
  0x24   : > { %1051 = vmatmul.mubr.msk.bf16.vlgmr.msra.gmra.mrb[4].mxu0 %vm299_vm0, %v314_v19 }
  0x25   : > { %1062 = vmatprep.mubr.msk.bf16.mxu0 %vm1163_vm1, %v1162_v0  ;;  %1061 = vmatpush3.bf16.msra.mxu0 %v631_v60 }
  0x26   : > { %1057 = vmatmul.mubr.msk.bf16.vlgmr.msra.gmra.mrb[4].mxu1 %vm299_vm0, %v315_v20  ;;  %1072 = vmatprep.subr.bf16.mxu0 %v1162_v0 }
  0x27   : > { %1068 = vmatprep.mubr.msk.bf16.mxu1 %vm1163_vm1, %v1162_v0  ;;  %1067 = vmatpush3.bf16.msra.mxu1 %v677_v62  ;;  %v595_v62 = vld [vmem:[#allocation5 + $0x8] sm:$0xff] }
  0x28   : > { %1078 = vmatprep.subr.bf16.mxu1 %v1162_v0 }
  0xef   : > { %v1264_v22 = vpop.f32.mrb[0].mxu0 }
  0xf0   : > { %v1040_v23 = vpop.f32.mrb[1].mxu0  ;;  %v505_v25 = vsel %vm299_vm0, %v1264_v22, -inf }
  0xf1   : > { %v1266_v24 = vpop.f32.mrb[0].mxu1  ;;  %506 = vmax.xlane.f32.xlu0 %v505_v25  ;;  %v360_v27 = vpop.f32.mrb[2].mxu0 }
  0xf2   : > { %v1046_v26 = vpop.f32.mrb[1].mxu1  ;;  %v1041_v28 = vpop.f32.mrb[3].mxu0  ;;  %v508_v30 = vsel %vm299_vm0, %v1266_v24, -inf }
  0xf3   : > { %v406_v29 = vpop.f32.mrb[2].mxu1 }
  0xf4   : > { %v1047_v31 = vpop.f32.mrb[3].mxu1 }
  0xf5   : > { %509 = vmax.xlane.f32.xlu0 %v508_v30 }
  0xf7   : > { %v1272_v32 = vpop.f32.mrb[4].mxu0 }
  0xf8   : > { %v1052_v33 = vpop.f32.mrb[5].mxu0  ;;  %v511_v35 = vsel %vm299_vm0, %v1272_v32, -inf }
  0xf9   : > { %v1274_v34 = vpop.f32.mrb[4].mxu1  ;;  %512 = vmax.xlane.f32.xlu1 %v511_v35  ;;  %v452_v37 = vpop.f32.mrb[6].mxu0  ;;  %v565_v35 = vld [vmem:[#allocation4] sm:$0xff] }
  0xfa   : > { %v1058_v36 = vpop.f32.mrb[5].mxu1  ;;  %v1053_v38 = vpop.f32.mrb[7].mxu0  ;;  %v514_v40 = vsel %vm299_vm0, %v1274_v34, -inf }
  0xfb   : > { %v498_v39 = vpop.f32.mrb[6].mxu1  ;;  %v566_v38 = vld [vmem:[#allocation4 + $0x8] sm:$0xff] }
  0xfc   : > { %v1059_v41 = vpop.f32.mrb[7].mxu1 }
  0xfd   : > { %515 = vmax.xlane.f32.xlu1 %v514_v40 }
 0x17e   : > { %v507_v44 = vpop.xlane.xlu0 %506 }
 0x17f   : > { %v1283_v45 = vmax.f32 %v1280_v43, %v507_v44 }
 0x181   : > { %v521_v47 = vsub.f32 %v1280_v43, %v1283_v45  ;;  %819 = vst.msk [vmem:[#allocation3] sm:$0xff] %vm290_vm3, %v1283_v45  ;;  %535 = vperm.xlu0 %1112, %v1283_v45  }
 0x182   : > { %v510_v48 = vpop.xlane.xlu0 %509 }
 0x183   : > { %v1293_v49 = vmax.f32 %v1285_v46, %v510_v48 }
 0x185   : > { %v522_v51 = vsub.f32 %v1285_v46, %v1293_v49  ;;  %820 = vst.msk [vmem:[#allocation3 + $0x8] sm:$0xff] %vm290_vm3, %v1293_v49  ;;  %540 = vperm.xlu1 %1113, %v1293_v49   ;;  %v568_v46 = vld [vmem:[#allocation4 + $0x18] sm:$0xff] }
 0x186   : > { %v513_v52 = vpop.xlane.xlu1 %512 }
 0x187   : > { %v1303_v53 = vmax.f32 %v1295_v50, %v513_v52  ;;  %v527_v26 = vmul.f32 1.442695, %v522_v51 }
 0x189   : > { %v523_v55 = vsub.f32 %v1295_v50, %v1303_v53  ;;  %821 = vst.msk [vmem:[#allocation3 + $0x10] sm:$0xff] %vm290_vm3, %v1303_v53  ;;  %545 = vperm.xlu1 %1113, %v1303_v53  }
 0x18a   : > { %v516_v56 = vpop.xlane.xlu1 %515 }
 0x18b   : > { %v1313_v57 = vmax.f32 %v1305_v54, %v516_v56  ;;  %v529_v29 = vmul.f32 1.442695, %v523_v55 }
 0x18d   : > { %v524_v58 = vsub.f32 %v1305_v54, %v1313_v57  ;;  %822 = vst.msk [vmem:[#allocation3 + $0x18] sm:$0xff] %vm290_vm3, %v1313_v57  ;;  %550 = vperm.xlu1 %1113, %v1313_v57  }
 0x18f   : > { %v531_v30 = vmul.f32 1.442695, %v524_v58 }
 0x200   : > { %v536_v4 = vpop.permute.xlu0 %535 }
 0x201   : > { %v553_v5 = vsub.f32 %v1264_v22, %v536_v4 }
 0x203   : > { %v557_v6 = vmul.f32 1.442695, %v553_v5 }
 0x204   : > { %v541_v7 = vpop.permute.xlu1 %540 }
 0x205   : > { %1114 = vpow2.f32 %v557_v6  ;;  %v554_v8 = vsub.f32 %v1266_v24, %v541_v7 }
 0x207   : > { %v559_v9 = vmul.f32 1.442695, %v554_v8  ;;  %v596_v8 = vld [vmem:[#allocation5 + $0x10] sm:$0xff] }
 0x208   : > { %v546_v10 = vpop.permute.xlu1 %545 }
 0x209   : > { %1116 = vpow2.f32 %v559_v9  ;;  %v555_v11 = vsub.f32 %v1272_v32, %v546_v10 }
 0x20b   : > { %v561_v12 = vmul.f32 1.442695, %v555_v11 }
 0x20c   : > { %v551_v13 = vpop.permute.xlu1 %550 }
 0x20d   : > { %1118 = vpow2.f32 %v561_v12  ;;  %v556_v14 = vsub.f32 %v1274_v34, %v551_v13 }
 0x20f   : > { %v1115_v15 = vpop.eup %1114  ;;  %v563_v16 = vmul.f32 1.442695, %v556_v14 }
 0x210   : > { %v573_v17 = vsel %vm299_vm0, %v1115_v15, 0.0  ;;  %v622_v18 = vpack.c.bf16 %v1115_v15, %v1115_v15  ;;  %v597_v15 = vld [vmem:[#allocation5 + $0x18] sm:$0xff] }
 0x211   : > { %1120 = vpow2.f32 %v563_v16  ;;  %574 = vadd.xlane.f32.xlu1 %v573_v17 }
 0x212   : > { %1063 = vmatmul.mubr.msk.bf16.vlgmr.msra.gmra.mrb[8].mxu0 %vm299_vm0, %v622_v18  ;;  %1122 = vpow2.f32 %v527_v26 }
 0x213   : > { %v1117_v19 = vpop.eup %1116  ;;  %1073 = vmatpush3.bf16.msra.mxu0 %v723_v1  ;;  %1074 = vmatprep.mubr.msk.bf16.mxu0 %vm1163_vm1, %v1162_v0 }
 0x214   : > { %v576_v20 = vsel %vm299_vm0, %v1117_v19, 0.0  ;;  %v623_v21 = vpack.c.bf16 %v1117_v19, %v1117_v19 }
 0x215   : > { %577 = vadd.xlane.f32.xlu0 %v576_v20 }
 0x216   : > { %1069 = vmatmul.mubr.msk.bf16.vlgmr.msra.gmra.mrb[8].mxu1 %vm299_vm0, %v623_v21 }
 0x217   : > { %v1119_v22 = vpop.eup %1118  ;;  %1079 = vmatpush3.bf16.msra.mxu1 %v769_v3  ;;  %1080 = vmatprep.mubr.msk.bf16.mxu1 %vm1163_vm1, %v1162_v0  ;;  %v525_v0 = vmul.f32 1.442695, %v521_v47 }
 0x218   : > { %v579_v23 = vsel %vm299_vm0, %v1119_v22, 0.0  ;;  %v624_v24 = vpack.c.bf16 %v1119_v22, %v1119_v22 }
 0x219   : > { %580 = vadd.xlane.f32.xlu1 %v579_v23  ;;  %1124 = vpow2.f32 %v525_v0 }
 0x21a   : > { %1075 = vmatmul.mubr.msk.bf16.vlgmr.msra.gmra.mrb[12].mxu0 %vm299_vm0, %v624_v24  ;;  %1126 = vpow2.f32 %v529_v29 }
 0x21b   : > { %v1121_v25 = vpop.eup %1120  ;;  %1128 = vpow2.f32 %v531_v30 }
 0x21c   : > { %v582_v27 = vsel %vm299_vm0, %v1121_v25, 0.0  ;;  %v625_v28 = vpack.c.bf16 %v1121_v25, %v1121_v25  ;;  %v1123_v31 = vpop.eup %1122 }
 0x21d   : > { %583 = vadd.xlane.f32.xlu1 %v582_v27  ;;  %v570_v40 = vmul.f32 %v1123_v31, %v566_v38 }
 0x21e   : > { %1081 = vmatmul.mubr.msk.bf16.vlgmr.msra.gmra.mrb[12].mxu1 %vm299_vm0, %v625_v28 }
 0x223   : > { %v1125_v32 = vpop.eup %1124 }
 0x224   : > { %v1127_v33 = vpop.eup %1126  ;;  %v569_v36 = vmul.f32 %v1125_v32, %v565_v35 }
 0x225   : > { %v1129_v34 = vpop.eup %1128  ;;  %v571_v44 = vmul.f32 %v1127_v33, %v567_v42 }
 0x226   : > { %v572_v49 = vmul.f32 %v1129_v34, %v568_v46 }
 0x22b   : > { %605 = vperm.xlu0 %1112, %v1123_v31  }
 0x22e   : > { %600 = vperm.xlu1 %1113, %v1125_v32  }
 0x232   : > { %610 = vperm.xlu1 %1113, %v1127_v33  }
 0x236   : > { %615 = vperm.xlu1 %1113, %v1129_v34  }
 0x29e   : > { %v575_v37 = vpop.xlane.xlu1 %574 }
 0x29f   : > { %v585_v39 = vadd.f32 %v575_v37, %v569_v36 }
 0x2a1   : > { %590 = vst.msk [vmem:[#allocation4] sm:$0xff] %vm290_vm3, %v585_v39 }
 0x2a2   : > { %v578_v41 = vpop.xlane.xlu0 %577 }
 0x2a3   : > { %v586_v43 = vadd.f32 %v578_v41, %v570_v40 }
 0x2a5   : > { %591 = vst.msk [vmem:[#allocation4 + $0x8] sm:$0xff] %vm290_vm3, %v586_v43 }
 0x2a6   : > { %v581_v45 = vpop.xlane.xlu1 %580 }
 0x2a7   : > { %v587_v47 = vadd.f32 %v581_v45, %v571_v44 }
 0x2a8   : > { %v826_v48 = vld [vmem:[#allocation4] sm:$0xff] }
 0x2a9   : > { %592 = vst.msk [vmem:[#allocation4 + $0x10] sm:$0xff] %vm290_vm3, %v587_v47  ;;  %1130 = vrcp.f32 %v826_v48 }
 0x2aa   : > { %v584_v50 = vpop.xlane.xlu1 %583  ;;  %v606_v63 = vpop.permute.xlu0 %605 }
 0x2ab   : > { %v588_v51 = vadd.f32 %v584_v50, %v572_v49  ;;  %v619_v6 = vmul.f32 %v606_v63, %v595_v62 }
 0x2ac   : > { %v827_v52 = vld [vmem:[#allocation4 + $0x8] sm:$0xff] }
 0x2ad   : > { %593 = vst.msk [vmem:[#allocation4 + $0x18] sm:$0xff] %vm290_vm3, %v588_v51  ;;  %1132 = vrcp.f32 %v827_v52 }
 0x2ae   : > { %v601_v60 = vpop.permute.xlu1 %600 }
 0x2af   : > { %v618_v61 = vmul.f32 %v601_v60, %v594_v59 }
 0x2b0   : > { %v828_v53 = vld [vmem:[#allocation4 + $0x10] sm:$0xff] }
 0x2b1   : > { %1134 = vrcp.f32 %v828_v53 }
 0x2b2   : > { %v611_v4 = vpop.permute.xlu1 %610 }
 0x2b3   : > { %v1131_v54 = vpop.eup %1130  ;;  %v620_v13 = vmul.f32 %v611_v4, %v596_v8 }
 0x2b4   : > { %840 = vperm.xlu1 %1113, %v1131_v54   ;;  %v829_v55 = vld [vmem:[#allocation4 + $0x18] sm:$0xff] }
 0x2b5   : > { %1136 = vrcp.f32 %v829_v55 }
 0x2b6   : > { %v616_v16 = vpop.permute.xlu1 %615 }
 0x2b7   : > { %v1133_v56 = vpop.eup %1132  ;;  %v621_v21 = vmul.f32 %v616_v16, %v597_v15 }
 0x2b8   : > { %845 = vperm.xlu0 %1112, %v1133_v56  }
 0x2bb   : > { %v1135_v57 = vpop.eup %1134 }
 0x2bc   : > { %850 = vperm.xlu1 %1113, %v1135_v57  }
 0x2bf   : > { %v1137_v58 = vpop.eup %1136 }
 0x2c0   : > { %855 = vperm.xlu0 %1112, %v1137_v58  }
 0x2e5   : > { %v667_v1 = vpop.f32.mrb[8].mxu0 }
 0x2e6   : > { %v811_v2 = vadd.f32 %v667_v1, %v618_v61  ;;  %v1064_v3 = vpop.f32.mrb[9].mxu0 }
 0x2e7   : > { %v670_v5 = vpop.f32.mrb[10].mxu0 }
 0x2e8   : > { %815 = vst.msk [vmem:[#allocation5] sm:$0xff] %vm299_vm0, %v811_v2  ;;  %v1065_v7 = vpop.f32.mrb[11].mxu0 }
 0x2e9   : > { %v713_v9 = vpop.f32.mrb[8].mxu1 }
 0x2ea   : > { %v812_v10 = vadd.f32 %v713_v9, %v619_v6  ;;  %v1070_v11 = vpop.f32.mrb[9].mxu1 }
 0x2eb   : > { %v716_v12 = vpop.f32.mrb[10].mxu1 }
 0x2ec   : > { %816 = vst.msk [vmem:[#allocation5 + $0x8] sm:$0xff] %vm299_vm0, %v812_v10  ;;  %v1071_v14 = vpop.f32.mrb[11].mxu1 }
 0x2ed   : > { %v759_v17 = vpop.f32.mrb[12].mxu0 }
 0x2ee   : > { %v813_v18 = vadd.f32 %v759_v17, %v620_v13  ;;  %v1076_v19 = vpop.f32.mrb[13].mxu0 }
 0x2ef   : > { %v762_v20 = vpop.f32.mrb[14].mxu0  ;;  %v834_v0 = vld [vmem:[#allocation5] sm:$0xff] }
 0x2f0   : > { %817 = vst.msk [vmem:[#allocation5 + $0x10] sm:$0xff] %vm299_vm0, %v813_v18  ;;  %v1077_v22 = vpop.f32.mrb[15].mxu0 }
 0x2f1   : > { %v805_v23 = vpop.f32.mrb[12].mxu1 }
 0x2f2   : > { %v814_v24 = vadd.f32 %v805_v23, %v621_v21  ;;  %v1082_v25 = vpop.f32.mrb[13].mxu1 }
 0x2f3   : > { %v808_v26 = vpop.f32.mrb[14].mxu1  ;;  %v835_v31 = vld [vmem:[#allocation5 + $0x8] sm:$0xff] }
 0x2f4   : > { %818 = vst.msk [vmem:[#allocation5 + $0x18] sm:$0xff] %vm299_vm0, %v814_v24  ;;  %v1083_v27 = vpop.f32.mrb[15].mxu1 }
 0x2f7   : > { %v836_v36 = vld [vmem:[#allocation5 + $0x10] sm:$0xff] }
 0x2fb   : > { %v837_v40 = vld [vmem:[#allocation5 + $0x18] sm:$0xff] }
 0x333   : > { %v841_v28 = vpop.permute.xlu1 %840 }
 0x334   : > { %v858_v29 = vmul.f32 %v841_v28, %v834_v0 }
 0x336   : > { %v862_v30 = vpack.c.bf16 %v858_v29, %v858_v29 }
 0x337   : > { %v846_v32 = vpop.permute.xlu0 %845 }
 0x338   : > { %867 = vst.msk [vmem:[%s270_s28] sm:$0xf] %vm285_vm2, %v862_v30  ;;  %v859_v33 = vmul.f32 %v846_v32, %v835_v31 }
 0x33a   : > { %v863_v34 = vpack.c.bf16 %v859_v33, %v859_v33 }
 0x33b   : > { %v851_v35 = vpop.permute.xlu1 %850 }
 0x33c   : > { %868 = vst.msk [vmem:[%s270_s28 + $0x4] sm:$0xf] %vm285_vm2, %v863_v34  ;;  %v860_v37 = vmul.f32 %v851_v35, %v836_v36 }
 0x33e   : > { %v864_v38 = vpack.c.bf16 %v860_v37, %v860_v37 }
 0x33f   : > { %v856_v39 = vpop.permute.xlu0 %855 }
 0x340   : > { %869 = vst.msk [vmem:[%s270_s28 + $0x8] sm:$0xf] %vm285_vm2, %v864_v38  ;;  %v861_v41 = vmul.f32 %v856_v39, %v837_v40 }
 0x342   : > { %v865_v42 = vpack.c.bf16 %v861_v41, %v861_v41 }
 0x344   : > { %870 = vst.msk [vmem:[%s270_s28 + $0xc] sm:$0xf] %vm285_vm2, %v865_v42 }
 0x345 PF: > { %s13_s14 = sadd.s32 1, %s1160_s14   ;;  %s1380_s12 = smov %s1156_s13 }
 0x346   : > { %p10_p5 = scmp.ge.s32.totalorder %s13_s14, 4   ;;  %s1381_s13 = smov %s1383_s15 }
 0x348   :  { %12 = sbr.rel (!%p10_p5) target bundleno = 2 (0x2), region = 76 }

</bundles_post_ra>
